<compile_context>
chip_gen: v5e
topology: v5e:2x2
jax: 0.10.0
libtpu: 0.0.40
codegen_flags: <defaults>
</compile_context>

<pallas_src>
import jax
import jax.numpy as jnp
from jax.experimental import pallas as pl
from jax.experimental.pallas import tpu as pltpu


def _round_up(n: int, m: int) -> int:
    return ((n + m - 1) // m) * m


def mlp_kernel(x_ref, w1t_ref, b1_ref, w2_ref, b2_ref, o_ref):
    # fc1 on the MXU: (TILE_B, D) @ (D, H) -> (TILE_B, H), f32 accumulation.
    h = jnp.dot(x_ref[...], w1t_ref[...], preferred_element_type=jnp.float32)
    h = jnp.maximum(h + b1_ref[...], 0.0)                 # bias + ReLU (VPU)
    # fc2: output width 1 -> skip the MXU, do broadcast-mul + lane reduce.
    y = jnp.sum(h * w2_ref[...], axis=-1, keepdims=True)  # (TILE_B, 1)
    o_ref[...] = (y + b2_ref[0]).astype(o_ref.dtype)      # b2 is an SMEM scalar


def two_layer_net(x, w1, b1, w2, b2, *, tile_b: int = 512):
    """Forward pass of TwoLayerNet.

    x:  (B, D) f32;  w1: (H, D) f32 (nn.Linear (out, in) layout);
    b1: (H,) f32;    w2: (1, H) f32;  b2: (1,) f32.   Returns (B, 1) f32.
    """
    B, D = x.shape
    H, _ = w1.shape

    # Glue: transpose W1 once so fc1 is a plain row-major MXU dot; give b1 a
    # broadcast row dim; w2 stays a (1, H) row for the lane reduction.
    w1_t = jnp.asarray(w1, jnp.float32).T                # (D, H)
    b1_r = jnp.asarray(b1, jnp.float32).reshape(1, H)
    w2_r = jnp.asarray(w2, jnp.float32).reshape(1, H)
    b2_r = jnp.asarray(b2, jnp.float32).reshape(1,)

    # Batch tiling: at most tile_b rows per grid step; pad B up to a multiple
    # of the tile so every block is full (padded rows sliced off below).
    tb = min(tile_b, _round_up(B, 8))
    b_pad = _round_up(B, tb)
    if b_pad != B:
        x = jnp.pad(x, ((0, b_pad - B), (0, 0)))

    out = pl.pallas_call(
        mlp_kernel,
        out_shape=jax.ShapeDtypeStruct((b_pad, 1), jnp.float32),
        grid=(b_pad // tb,),
        in_specs=[
            pl.BlockSpec((tb, D), lambda i: (i, 0)),        # x: streamed tiles
            pl.BlockSpec((D, H), lambda i: (0, 0)),         # W1^T: VMEM resident
            pl.BlockSpec((1, H), lambda i: (0, 0)),         # b1:   VMEM resident
            pl.BlockSpec((1, H), lambda i: (0, 0)),         # w2 row: VMEM resident
            pl.BlockSpec(memory_space=pltpu.MemorySpace.SMEM),  # b2 scalar
        ],
        out_specs=pl.BlockSpec((tb, 1), lambda i: (i, 0)),
        compiler_params=pltpu.CompilerParams(
            dimension_semantics=("parallel",),   # megacore sharding on v7x
            vmem_limit_bytes=32 * 1024 * 1024,
        ),
    )(x, w1_t, b1_r, w2_r, b2_r)

    return out[:B]


if __name__ == "__main__":
    # Small, deterministic shapes consistent with the module.
    batch, input_size, hidden_size = 8, 16, 32

    key = jax.random.PRNGKey(0)
    kx, k1, kb1, k2, kb2, kx2 = jax.random.split(key, 6)

    x = jax.random.normal(kx, (batch, input_size), dtype=jnp.float32)

    # PyTorch-style uniform(-1/sqrt(fan_in), +1/sqrt(fan_in)) init.
    bound1 = 1.0 / jnp.sqrt(jnp.float32(input_size))
    w1 = jax.random.uniform(k1, (hidden_size, input_size), jnp.float32,
                            -bound1, bound1)            # (out, in) like nn.Linear
    b1 = jax.random.uniform(kb1, (hidden_size,), jnp.float32, -bound1, bound1)
    bound2 = 1.0 / jnp.sqrt(jnp.float32(hidden_size))
    w2 = jax.random.uniform(k2, (1, hidden_size), jnp.float32, -bound2, bound2)
    b2 = jax.random.uniform(kb2, (1,), jnp.float32, -bound2, bound2)

    def ref_fwd(xv):
        return jnp.maximum(xv @ w1.T + b1, 0.0) @ w2.T + b2

    # Case 1: small single-tile batch.
    out = jax.block_until_ready(two_layer_net(x, w1, b1, w2, b2))
    assert out.shape == (batch, 1)
    assert jnp.allclose(out, ref_fwd(x), atol=1e-5, rtol=1e-5)

    # Case 2: multi-tile batch exercising the grid + tail padding (B=200, tile=64).
    x2 = jax.random.normal(kx2, (200, input_size), dtype=jnp.float32)
    out2 = jax.block_until_ready(two_layer_net(x2, w1, b1, w2, b2, tile_b=64))
    assert out2.shape == (200, 1)
    assert jnp.allclose(out2, ref_fwd(x2), atol=1e-5, rtol=1e-5)

    print("KERNEL_OK")
</pallas_src>

<mosaic_0001>
module attributes {stable_mosaic.version = 11 : i64} {
  func.func @mlp_kernel(%arg0: i32, %arg1: memref<8x16xf32, #tpu.memory_space<vmem>>, %arg2: memref<16x32xf32, #tpu.memory_space<vmem>>, %arg3: memref<1x32xf32, #tpu.memory_space<vmem>>, %arg4: memref<1x32xf32, #tpu.memory_space<vmem>>, %arg5: memref<1xf32, #tpu.memory_space<smem>>, %arg6: memref<8x1xf32, #tpu.memory_space<vmem>>) attributes {dimension_semantics = [#tpu.dimension_semantics<parallel>], iteration_bounds = array<i64: 1>, scalar_prefetch = 0 : i64, scratch_operands = 0 : i64, tpu.core_type = #tpu.core_type<tc>, window_params = [{transform_indices = @transform_0, window_bounds = array<i64: 8, 16>}, {pipeline_mode = #tpu.pipeline_mode<synchronous>, transform_indices = @transform_1, window_bounds = array<i64: 16, 32>}, {pipeline_mode = #tpu.pipeline_mode<synchronous>, transform_indices = @transform_2, window_bounds = array<i64: 1, 32>}, {pipeline_mode = #tpu.pipeline_mode<synchronous>, transform_indices = @transform_3, window_bounds = array<i64: 1, 32>}, {transform_indices = @transform_4, window_bounds = array<i64: 1>}, {transform_indices = @transform_5, window_bounds = array<i64: 8, 1>}]} {
    %c0 = arith.constant 0 : index
    %c0_0 = arith.constant 0 : index
    %0 = vector.load %arg1[%c0, %c0_0] : memref<8x16xf32, #tpu.memory_space<vmem>>, vector<8x16xf32>
    %c0_1 = arith.constant 0 : index
    %c0_2 = arith.constant 0 : index
    %1 = vector.load %arg2[%c0_1, %c0_2] : memref<16x32xf32, #tpu.memory_space<vmem>>, vector<16x32xf32>
    %cst = arith.constant dense<0.000000e+00> : vector<8x32xf32>
    %2 = tpu.matmul %0, %1, %cst {dimension_numbers = #tpu.dot_dimension_numbers<[1], [0], [0], [1], [0, 0, 1, 1], [], []>} : vector<8x16xf32>, vector<16x32xf32>, vector<8x32xf32> -> vector<8x32xf32>
    %c0_3 = arith.constant 0 : index
    %c0_4 = arith.constant 0 : index
    %3 = vector.load %arg3[%c0_3, %c0_4] : memref<1x32xf32, #tpu.memory_space<vmem>>, vector<1x32xf32>
    %4 = vector.broadcast %3 : vector<1x32xf32> to vector<8x32xf32>
    %5 = arith.addf %2, %4 : vector<8x32xf32>
    %cst_5 = arith.constant 0.000000e+00 : f32
    %6 = vector.broadcast %cst_5 : f32 to vector<8x32xf32>
    %7 = arith.maximumf %5, %6 : vector<8x32xf32>
    %c0_6 = arith.constant 0 : index
    %c0_7 = arith.constant 0 : index
    %8 = vector.load %arg4[%c0_6, %c0_7] : memref<1x32xf32, #tpu.memory_space<vmem>>, vector<1x32xf32>
    %9 = vector.broadcast %8 : vector<1x32xf32> to vector<8x32xf32>
    %10 = arith.mulf %7, %9 : vector<8x32xf32>
    %cst_8 = arith.constant dense<0.000000e+00> : vector<8xf32>
    %11 = vector.multi_reduction <add>, %10, %cst_8 [1] : vector<8x32xf32> to vector<8xf32>
    %12 = vector.shape_cast %11 : vector<8xf32> to vector<8x1xf32>
    %c0_9 = arith.constant 0 : index
    %13 = memref.load %arg5[%c0_9] : memref<1xf32, #tpu.memory_space<smem>>
    %14 = vector.broadcast %13 : f32 to vector<8x1xf32>
    %15 = arith.addf %12, %14 : vector<8x1xf32>
    %c0_10 = arith.constant 0 : index
    %c0_11 = arith.constant 0 : index
    %16 = vector.load %arg6[%c0_10, %c0_11] : memref<8x1xf32, #tpu.memory_space<vmem>>, vector<8x1xf32>
    tpu.vector_store %arg6[%c0_10, %c0_11], %15 {strides = array<i32>} : memref<8x1xf32, #tpu.memory_space<vmem>>, vector<8x1xf32>,
    return
  }
  func.func @transform_0(%arg0: i32) -> (i32, i32) {
    %c0_i32 = arith.constant 0 : i32
    %c0_i32_0 = arith.constant 0 : i32
    return %arg0, %c0_i32 : i32, i32
  }
  func.func @transform_1(%arg0: i32) -> (i32, i32) {
    %c0_i32 = arith.constant 0 : i32
    %c0_i32_0 = arith.constant 0 : i32
    %c0_i32_1 = arith.constant 0 : i32
    return %c0_i32, %c0_i32_0 : i32, i32
  }
  func.func @transform_2(%arg0: i32) -> (i32, i32) {
    %c0_i32 = arith.constant 0 : i32
    %c0_i32_0 = arith.constant 0 : i32
    %c0_i32_1 = arith.constant 0 : i32
    return %c0_i32, %c0_i32_0 : i32, i32
  }
  func.func @transform_3(%arg0: i32) -> (i32, i32) {
    %c0_i32 = arith.constant 0 : i32
    %c0_i32_0 = arith.constant 0 : i32
    %c0_i32_1 = arith.constant 0 : i32
    return %c0_i32, %c0_i32_0 : i32, i32
  }
  func.func @transform_4(%arg0: i32) -> i32 {
    %c0_i32 = arith.constant 0 : i32
    %c0_i32_0 = arith.constant 0 : i32
    return %c0_i32 : i32
  }
  func.func @transform_5(%arg0: i32) -> (i32, i32) {
    %c0_i32 = arith.constant 0 : i32
    %c0_i32_0 = arith.constant 0 : i32
    return %arg0, %c0_i32 : i32, i32
  }
}

</mosaic_0001>

<bundles_post_ra>
// kernel: tpu_custom_call.1
= control target key start
LH: loop header
LB: loop body
LE: loop exit
PB: predicated region body
PF: predicated region fallthrough
CT: control target
= control target key end

     0   :  { %11 = vsyncpa [#allocation4], 0  ;;  %s214_s0 = inlined_call_operand.hbm [shape: f32[8,16], index: 0, kind: input, shape index: {}]   ;;  %s215_s1 = inlined_call_operand.hbm [shape: f32[16,32], index: 1, kind: input, shape index: {}]   ;;  %s216_s2 = inlined_call_operand.vmem [shape: f32[1,32], index: 2, kind: input, shape index: {}]   ;;  %s217_s3 = inlined_call_operand.vmem [shape: f32[1,32], index: 3, kind: input, shape index: {}]   ;;  %s218_s4 = inlined_call_operand.<no memory space> [shape: f32[1], index: 4, kind: input, shape index: {}]   ;;  %s219_s5 = inlined_call_operand.vmem [shape: f32[8,1], index: 5, kind: output, shape index: {}]  }
   0x1   :  { %s18_s20 = sshll.u32 %s214_s0, 4  ;;  %s19_s20 = int_to_ptr.hbm [resolvable:$true] %s18_s20 }
   0x2   :  { %12 = vsyncpa [#allocation6], 0  ;;  %s162_s21 = smov [#allocation3]   ;;  %s28_s25 = sshll.u32 %s215_s1, 4  ;;  %s29_s25 = int_to_ptr.hbm [resolvable:$true] %s28_s25 }
   0x3   :  { %s20_s22 = sshll.u32 %s162_s21, 4  ;;  %s163_s26 = smov [#allocation5]   ;;  %s21_s22 = int_to_ptr.vmem [resolvable:$true] %s20_s22 }
   0x4   :  { %23 = dma.hbm_to_vmem [thread:$0]  %s19_s20, 128, %s21_s22, [#allocation4]  }
   0x5   :  { %s30_s27 = sshll.u32 %s163_s26, 4  ;;  %s164_s28 = smov 128   ;;  %s31_s27 = int_to_ptr.vmem [resolvable:$true] %s30_s27 }
   0x6   :  { %s165_s29 = smov 8  }
   0x7   :  { %36 = dma.hbm_to_vmem [thread:$0]  %s29_s25, 256, %s31_s27, [#allocation6], %s164_s28, %s164_s28, %s165_s29  }
   0x8   :  { %158 = dma.done.wait [#allocation4], 128  }
   0x9   :  { %159 = vsyncadd [#allocation4], 4294967168 }
   0xa   :  { %160 = dma.done.wait [#allocation6], 256  }
   0xb   :  { %161 = vsyncadd [#allocation6], 4294967040  ;;  %v53_v0 = vld [vmem:[#allocation5 + $0x8] sm:$0xff]  ;;  %v52_v1 = vld [vmem:[#allocation5] sm:$0xff]  ;;  %vm58_vm0 = vcmask 130048   ;;  %vm88_vm1 = vcmask 261120   ;;  %v93_v10 = vstv %s218_s4 }
   0xc   :  { %76 = vmatpush.msra.mxu0 %v53_v0  ;;  %v51_v2 = vld [vmem:[#allocation3] sm:$0xff]  ;;  %vm95_vm2 = vcmask 7168  }
   0xd   :  { %v108_v3 = vld [vmem:[%s216_s2] ss:$0 sm:$0xff] }
   0xe   :  { %77 = vmatpush.msra.mxu0 %v52_v1  ;;  %v109_v6 = vld [vmem:[%s217_s3] ss:$0 sm:$0xff] }
   0xf   :  { %103 = vmatmul.msk.f32.vlgmr.msra.gmra.mxu0 %vm58_vm0, %v51_v2 }
  0x8c   :  { %v79_v4 = vpop.f32.mrf.mxu0 }
  0x8d   :  { %v80_v5 = vadd.f32 %v108_v3, %v79_v4 }
  0x8f   :  { %v82_v7 = vmax.f32 %v80_v5, 0.0 }
  0x91   :  { %v87_v8 = vmul.f32 %v109_v6, %v82_v7 }
  0x93   :  { %v89_v9 = vsel %vm88_vm1, %v87_v8, 0.0 }
  0x94   :  { %90 = vadd.xlane.f32.xlu0 %v89_v9 }
 0x107   :  { %v91_v11 = vpop.xlane.xlu0 %90 }
 0x108   :  { %v94_v12 = vadd.f32 %v93_v10, %v91_v11 }
 0x10a   :  { %96 = vst.msk [vmem:[%s219_s5] sm:$0xff] %vm95_vm2, %v94_v12 }
 0x10b   :  { %101 = vsyncpa [#allocation4], 1 }
 0x10c   :  { %102 = vsyncpa [#allocation6], 1 }

</bundles_post_ra>
